<compile_context>
chip_gen: v6e
topology: v6e:2x2x1
jax: 0.10.0
libtpu: 0.0.40
codegen_flags: <defaults>
</compile_context>

<pallas_src>
import functools

import jax
import jax.numpy as jnp
from jax import lax
from jax.experimental import pallas as pl
from jax.experimental.pallas import tpu as pltpu


# ----------------------------------------------------------------------------
# Pallas kernel
# ----------------------------------------------------------------------------
def _convg2_kernel(xt_ref, xl_ref, w_ref, b_ref, g_ref, out_ref,
                   *, cin, cout, h, w, kh, kw):
    """One grid step = `bsz` images.

    For each image: build the transposed im2col patch matrix in VMEM from
    KH*KW shifted lane-slices of the flattened channel planes, run one merged
    bf16 MXU matmul for all six convs, apply the packed per-channel gates and
    write [y | u1,u2,ustd | mu1,mu2,std] as channel rows of the NCHW-ordered
    output block.
    """
    bsz = out_ref.shape[0]
    c = cout
    oh1 = h - kh + 1
    owide = oh1 * w                    # "full-width" stride-1 output columns

    wmat = w_ref[...]                  # (3C, 2K)  bf16, resident
    bias = b_ref[...]                  # (3C, 1)   f32
    g = g_ref[...]                     # (3C, 5)   f32

    for bb in range(bsz):
        # (Cin, H*W) each; stack top over lat along the channel (sublane) dim.
        x2 = jnp.concatenate([xt_ref[bb], xl_ref[bb]], axis=0)  # (2Cin, H*W)
        if kw > 1:
            # Lane pad so the last tap's contiguous slice stays in bounds; the
            # padded lanes only feed the (discarded) ow >= OW1 output columns.
            x2 = jnp.concatenate(
                [x2, jnp.zeros((2 * cin, kw - 1), x2.dtype)], axis=-1)

        # Transposed im2col: row = (tap i,j -> src -> cin), col = oh*W + ow.
        taps = [x2[:, (i * w + j):(i * w + j) + owide]
                for i in range(kh) for j in range(kw)]
        pt = jnp.concatenate(taps, axis=0).astype(wmat.dtype)   # (2K, OWIDE)

        # One fused MXU matmul for all six convs: U = [u1; u2; ustd] (f32).
        u = jnp.dot(wmat, pt, preferred_element_type=jnp.float32) + bias

        # Packed per-channel gating for all three gates at once (f32).
        mu = (g[:, 0:1] * jax.nn.sigmoid(g[:, 1:2] * u + g[:, 2:3])
              + g[:, 3:4] * u + g[:, 4:5])                      # [mu1;mu2;std]
        mu1 = mu[0 * c:1 * c]
        mu2 = mu[1 * c:2 * c]
        std = mu[2 * c:3 * c]
        y = mu2 + (mu1 - mu2) * std

        # Direct channel-row writes: no concat, no pad lanes, no transpose.
        out_ref[bb, 0:c, :] = y
        out_ref[bb, c:4 * c, :] = u
        out_ref[bb, 4 * c:7 * c, :] = mu


# ----------------------------------------------------------------------------
# Wrapper
# ----------------------------------------------------------------------------
def _pick_batch_block(n, m_per_image, target_m=2048):
    """Images per grid step: grow per-step M toward `target_m`, but keep at
    least 2 grid steps so the v7x megacore has work for both TensorCores."""
    best = 1
    for b in range(1, n + 1):
        if n % b:
            continue
        if b > 1 and b * m_per_image > target_m:
            continue
        if n >= 2 and n // b < 2:
            continue
        best = b
    return best


def convg2_forward(x_top, x_lat, params, *, kernel_size, stride=1):
    # x_top, x_lat: NCHW float32.
    n, cin, h, w = x_top.shape
    cout = params['a1'].shape[0]
    kh = kw = kernel_size
    oh1, ow1 = h - kh + 1, w - kw + 1          # stride-1 output extent
    oh = (h - kh) // stride + 1
    ow = (w - kw) // stride + 1
    owide = oh1 * w                            # kernel's full-width columns
    k2 = 2 * kh * kw * cin

    # Free (metadata-only) reshapes: flatten each channel plane along (H, W).
    xt = x_top.reshape(n, cin, h * w)
    xl = x_lat.reshape(n, cin, h * w)

    # Pack the six conv weights into one (3*Cout, 2K) bf16 matrix whose K
    # ordering (tap i,j -> src(top/lat) -> cin) matches the in-kernel patch
    # construction.
    def pack(a, b):                            # OIHW, OIHW -> (2K, Cout)
        wa = jnp.transpose(a, (2, 3, 1, 0))    # (KH, KW, Cin, Cout)
        wb = jnp.transpose(b, (2, 3, 1, 0))
        return jnp.stack([wa, wb], axis=2).reshape(k2, cout)

    wmat = jnp.concatenate([pack(params['a1'], params['b1']),
                            pack(params['a2'], params['b2']),
                            pack(params['astd'], params['bstd'])],
                           axis=1).T.astype(jnp.bfloat16)           # (3C, 2K)
    bias = jnp.concatenate([params['b1_bias'], params['b2_bias'],
                            params['bstd_bias']]).reshape(3 * cout, 1)
    gates = jnp.concatenate([params['w1'].T, params['w2'].T,
                             params['wstd'].T], axis=0)             # (3C, 5)

    bsz = _pick_batch_block(n, owide)
    n_steps = n // bsz

    kern = functools.partial(_convg2_kernel, cin=cin, cout=cout,
                             h=h, w=w, kh=kh, kw=kw)

    # VMEM budget: per-step blocks (double buffered) + in-kernel values.
    step_bytes = (2 * bsz * cin * h * w * 4          # input blocks
                  + bsz * 7 * cout * owide * 4       # output block
                  + k2 * owide * 6                   # patches (f32 + bf16)
                  + 3 * cout * owide * 12)           # U, MU, y values
    vmem_limit = int(min(100 * 2**20, max(16 * 2**20, 4 * step_bytes)))

    cost = pl.CostEstimate(
        flops=int(n * (2 * 3 * cout * k2 * owide + 12 * 3 * cout * owide)),
        transcendentals=int(n * 3 * cout * owide),
        bytes_accessed=int(4 * (2 * n * cin * h * w + n * 7 * cout * owide)
                           + 2 * 3 * cout * k2 + 4 * 3 * cout * 6),
    )

    out = pl.pallas_call(
        kern,
        grid=(n_steps,),
        in_specs=[
            pl.BlockSpec((bsz, cin, h * w), lambda s: (s, 0, 0)),   # x_top
            pl.BlockSpec((bsz, cin, h * w), lambda s: (s, 0, 0)),   # x_lat
            pl.BlockSpec((3 * cout, k2), lambda s: (0, 0)),         # weights
            pl.BlockSpec((3 * cout, 1), lambda s: (0, 0)),          # bias
            pl.BlockSpec((3 * cout, 5), lambda s: (0, 0)),          # gates
        ],
        out_specs=pl.BlockSpec((bsz, 7 * cout, owide), lambda s: (s, 0, 0)),
        out_shape=jax.ShapeDtypeStruct((n, 7 * cout, owide), jnp.float32),
        compiler_params=pltpu.CompilerParams(
            dimension_semantics=("parallel",),
            vmem_limit_bytes=vmem_limit),
        cost_estimate=cost,
    )(xt, xl, wmat, bias, gates)

    # Free reshape to NCHW-ordered slab; the slices below (channel split +
    # dropping the invalid ow >= OW1 columns + stride subsampling) are the only
    # post-kernel data movement and are required anyway to return 7 arrays.
    out = out.reshape(n, 7 * cout, oh1, w)
    rs = slice(0, (oh - 1) * stride + 1, stride)
    cs = slice(0, (ow - 1) * stride + 1, stride)

    def grab(idx):
        return out[:, idx * cout:(idx + 1) * cout, rs, cs]

    y, u1, u2, ustd, mu1, mu2, std = (grab(i) for i in range(7))
    return y, (u1, u2, ustd), (mu1, mu2, std)


# ----------------------------------------------------------------------------
# Pure-JAX reference (mirrors the PyTorch module) for correctness checking
# ----------------------------------------------------------------------------
def convg2_reference(x_top, x_lat, params, *, stride):
    def conv(x, w):
        return lax.conv_general_dilated(
            x, w, window_strides=(stride, stride), padding='VALID',
            dimension_numbers=('NCHW', 'OIHW', 'NCHW'))

    u1 = conv(x_top, params['a1']) + conv(x_lat, params['b1']) \
        + params['b1_bias'][None, :, None, None]
    u2 = conv(x_top, params['a2']) + conv(x_lat, params['b2']) \
        + params['b2_bias'][None, :, None, None]
    ustd = conv(x_top, params['astd']) + conv(x_lat, params['bstd']) \
        + params['bstd_bias'][None, :, None, None]

    def gate(u, wp):
        ws = [wp[i][None, :, None, None] for i in range(5)]
        return ws[0] * jax.nn.sigmoid(ws[1] * u + ws[2]) + ws[3] * u + ws[4]

    mu1 = gate(u1, params['w1'])
    mu2 = gate(u2, params['w2'])
    std = gate(ustd, params['wstd'])
    y = mu1 * std + mu2 * (1.0 - std)
    return y, (u1, u2, ustd), (mu1, mu2, std)


def _flatten(res):
    y, (u1, u2, ustd), (mu1, mu2, std) = res
    return (y, u1, u2, ustd, mu1, mu2, std)


# ----------------------------------------------------------------------------
if __name__ == "__main__":
    N, CIN, COUT, H, W, KS, STRIDE = 2, 4, 8, 16, 16, 3, 1

    key = jax.random.PRNGKey(0)
    keys = jax.random.split(key, 16)

    def rnd(k, shape, scale=0.1):
        return scale * jax.random.normal(k, shape, dtype=jnp.float32)

    base_gate = jnp.array([[0.], [1.], [0.], [0.], [0.]], jnp.float32) \
        * jnp.ones((5, COUT), jnp.float32)
    params = {
        'a1':   rnd(keys[0], (COUT, CIN, KS, KS)),
        'a2':   rnd(keys[1], (COUT, CIN, KS, KS)),
        'astd': rnd(keys[2], (COUT, CIN, KS, KS)),
        'b1':   rnd(keys[3], (COUT, CIN, KS, KS)),
        'b2':   rnd(keys[4], (COUT, CIN, KS, KS)),
        'bstd': rnd(keys[5], (COUT, CIN, KS, KS)),
        'b1_bias':   rnd(keys[6], (COUT,)),
        'b2_bias':   rnd(keys[7], (COUT,)),
        'bstd_bias': rnd(keys[8], (COUT,)),
        # Module init is zeros with index 1 == 1; perturb so the gate path is
        # non-trivial while keeping the (5 x Cout) per-channel shapes.
        'w1':   base_gate + rnd(keys[9], (5, COUT)),
        'w2':   base_gate + rnd(keys[10], (5, COUT)),
        'wstd': base_gate + rnd(keys[11], (5, COUT)),
    }

    x_top = jax.random.normal(keys[12], (N, CIN, H, W), dtype=jnp.float32)
    x_lat = jax.random.normal(keys[13], (N, CIN, H, W), dtype=jnp.float32)

    fwd = jax.jit(functools.partial(convg2_forward,
                                    kernel_size=KS, stride=STRIDE))
    res = fwd(x_top, x_lat, params)
    jax.block_until_ready(res[0])
    got = _flatten(res)

    # Tight check: reference with the same bf16 rounding of inputs / conv
    # weights (bias, gates and all post-matmul math are f32 in both).
    def q(a):
        return a.astype(jnp.bfloat16).astype(jnp.float32)

    qparams = dict(params)
    for name in ('a1', 'a2', 'astd', 'b1', 'b2', 'bstd'):
        qparams[name] = q(params[name])
    ref_q = _flatten(convg2_reference(q(x_top), q(x_lat), qparams,
                                      stride=STRIDE))
    # Loose sanity check against the full-f32 reference (bf16 rounding error).
    ref_f = _flatten(convg2_reference(x_top, x_lat, params, stride=STRIDE))

    for g_, rq, rf in zip(got, ref_q, ref_f):
        assert g_.shape == rf.shape, (g_.shape, rf.shape)
        tight = float(jnp.max(jnp.abs(g_ - rq)))
        loose = float(jnp.max(jnp.abs(g_ - rf)))
        assert tight < 1e-3, tight
        assert loose < 1e-1, loose

    print("KERNEL_OK")
</pallas_src>

<mosaic_0001>
module attributes {stable_mosaic.version = 11 : i64} {
  func.func @_convg2_kernel(%arg0: i32, %arg1: memref<1x4x256xf32, #tpu.memory_space<vmem>>, %arg2: memref<1x4x256xf32, #tpu.memory_space<vmem>>, %arg3: memref<24x72xbf16, #tpu.memory_space<vmem>>, %arg4: memref<24x1xf32, #tpu.memory_space<vmem>>, %arg5: memref<24x5xf32, #tpu.memory_space<vmem>>, %arg6: memref<1x56x224xf32, #tpu.memory_space<vmem>>) attributes {dimension_semantics = [#tpu.dimension_semantics<parallel>], iteration_bounds = array<i64: 2>, scalar_prefetch = 0 : i64, scratch_operands = 0 : i64, tpu.core_type = #tpu.core_type<tc>, window_params = [{transform_indices = @transform_0, window_bounds = array<i64: 1, 4, 256>}, {transform_indices = @transform_1, window_bounds = array<i64: 1, 4, 256>}, {pipeline_mode = #tpu.pipeline_mode<synchronous>, transform_indices = @transform_2, window_bounds = array<i64: 24, 72>}, {pipeline_mode = #tpu.pipeline_mode<synchronous>, transform_indices = @transform_3, window_bounds = array<i64: 24, 1>}, {pipeline_mode = #tpu.pipeline_mode<synchronous>, transform_indices = @transform_4, window_bounds = array<i64: 24, 5>}, {transform_indices = @transform_5, window_bounds = array<i64: 1, 56, 224>}]} {
    %c0 = arith.constant 0 : index
    %c0_0 = arith.constant 0 : index
    %0 = vector.load %arg3[%c0, %c0_0] : memref<24x72xbf16, #tpu.memory_space<vmem>>, vector<24x72xbf16>
    %c0_1 = arith.constant 0 : index
    %c0_2 = arith.constant 0 : index
    %1 = vector.load %arg4[%c0_1, %c0_2] : memref<24x1xf32, #tpu.memory_space<vmem>>, vector<24x1xf32>
    %c0_3 = arith.constant 0 : index
    %c0_4 = arith.constant 0 : index
    %2 = vector.load %arg5[%c0_3, %c0_4] : memref<24x5xf32, #tpu.memory_space<vmem>>, vector<24x5xf32>
    %c0_5 = arith.constant 0 : index
    %c0_6 = arith.constant 0 : index
    %c0_7 = arith.constant 0 : index
    %3 = vector.load %arg1[%c0_5, %c0_6, %c0_7] : memref<1x4x256xf32, #tpu.memory_space<vmem>>, vector<1x4x256xf32>
    %4 = vector.shape_cast %3 : vector<1x4x256xf32> to vector<4x256xf32>
    %c0_8 = arith.constant 0 : index
    %c0_9 = arith.constant 0 : index
    %c0_10 = arith.constant 0 : index
    %5 = vector.load %arg2[%c0_8, %c0_9, %c0_10] : memref<1x4x256xf32, #tpu.memory_space<vmem>>, vector<1x4x256xf32>
    %6 = vector.shape_cast %5 : vector<1x4x256xf32> to vector<4x256xf32>
    %7 = tpu.concatenate %4, %6 in 0 : vector<4x256xf32>, vector<4x256xf32> -> vector<8x256xf32>
    %cst = arith.constant 0.000000e+00 : f32
    %8 = vector.broadcast %cst : f32 to vector<8x2xf32>
    %9 = tpu.concatenate %7, %8 in 1 : vector<8x256xf32>, vector<8x2xf32> -> vector<8x258xf32>
    %10 = vector.extract_strided_slice %9 {offsets = [0, 0], sizes = [8, 224], strides = [1, 1]} : vector<8x258xf32> to vector<8x224xf32>
    %11 = vector.extract_strided_slice %9 {offsets = [0, 1], sizes = [8, 224], strides = [1, 1]} : vector<8x258xf32> to vector<8x224xf32>
    %12 = vector.extract_strided_slice %9 {offsets = [0, 2], sizes = [8, 224], strides = [1, 1]} : vector<8x258xf32> to vector<8x224xf32>
    %13 = vector.extract_strided_slice %9 {offsets = [0, 16], sizes = [8, 224], strides = [1, 1]} : vector<8x258xf32> to vector<8x224xf32>
    %14 = vector.extract_strided_slice %9 {offsets = [0, 17], sizes = [8, 224], strides = [1, 1]} : vector<8x258xf32> to vector<8x224xf32>
    %15 = vector.extract_strided_slice %9 {offsets = [0, 18], sizes = [8, 224], strides = [1, 1]} : vector<8x258xf32> to vector<8x224xf32>
    %16 = vector.extract_strided_slice %9 {offsets = [0, 32], sizes = [8, 224], strides = [1, 1]} : vector<8x258xf32> to vector<8x224xf32>
    %17 = vector.extract_strided_slice %9 {offsets = [0, 33], sizes = [8, 224], strides = [1, 1]} : vector<8x258xf32> to vector<8x224xf32>
    %18 = vector.extract_strided_slice %9 {offsets = [0, 34], sizes = [8, 224], strides = [1, 1]} : vector<8x258xf32> to vector<8x224xf32>
    %19 = tpu.concatenate %10, %11, %12, %13, %14, %15, %16, %17, %18 in 0 : vector<8x224xf32>, vector<8x224xf32>, vector<8x224xf32>, vector<8x224xf32>, vector<8x224xf32>, vector<8x224xf32>, vector<8x224xf32>, vector<8x224xf32>, vector<8x224xf32> -> vector<72x224xf32>
    %20 = arith.truncf %19 : vector<72x224xf32> to vector<72x224xbf16>
    %cst_11 = arith.constant dense<0.000000e+00> : vector<24x224xf32>
    %21 = tpu.matmul %0, %20, %cst_11 {dimension_numbers = #tpu.dot_dimension_numbers<[1], [0], [0], [1], [0, 0, 1, 1], [], []>} : vector<24x72xbf16>, vector<72x224xbf16>, vector<24x224xf32> -> vector<24x224xf32>
    %22 = vector.broadcast %1 : vector<24x1xf32> to vector<24x224xf32>
    %23 = arith.addf %21, %22 : vector<24x224xf32>
    %24 = vector.extract_strided_slice %2 {offsets = [0, 0], sizes = [24, 1], strides = [1, 1]} : vector<24x5xf32> to vector<24x1xf32>
    %25 = vector.extract_strided_slice %2 {offsets = [0, 1], sizes = [24, 1], strides = [1, 1]} : vector<24x5xf32> to vector<24x1xf32>
    %26 = vector.broadcast %25 : vector<24x1xf32> to vector<24x224xf32>
    %27 = arith.mulf %26, %23 : vector<24x224xf32>
    %28 = vector.extract_strided_slice %2 {offsets = [0, 2], sizes = [24, 1], strides = [1, 1]} : vector<24x5xf32> to vector<24x1xf32>
    %29 = vector.broadcast %28 : vector<24x1xf32> to vector<24x224xf32>
    %30 = arith.addf %27, %29 : vector<24x224xf32>
    %31 = arith.negf %30 : vector<24x224xf32>
    %32 = math.exp %31 : vector<24x224xf32>
    %cst_12 = arith.constant 1.000000e+00 : f32
    %33 = vector.broadcast %cst_12 : f32 to vector<24x224xf32>
    %34 = arith.addf %33, %32 : vector<24x224xf32>
    %35 = arith.divf %33, %34 : vector<24x224xf32>
    %36 = vector.broadcast %24 : vector<24x1xf32> to vector<24x224xf32>
    %37 = arith.mulf %36, %35 : vector<24x224xf32>
    %38 = vector.extract_strided_slice %2 {offsets = [0, 3], sizes = [24, 1], strides = [1, 1]} : vector<24x5xf32> to vector<24x1xf32>
    %39 = vector.broadcast %38 : vector<24x1xf32> to vector<24x224xf32>
    %40 = arith.mulf %39, %23 : vector<24x224xf32>
    %41 = arith.addf %37, %40 : vector<24x224xf32>
    %42 = vector.extract_strided_slice %2 {offsets = [0, 4], sizes = [24, 1], strides = [1, 1]} : vector<24x5xf32> to vector<24x1xf32>
    %43 = vector.broadcast %42 : vector<24x1xf32> to vector<24x224xf32>
    %44 = arith.addf %41, %43 : vector<24x224xf32>
    %45 = vector.extract_strided_slice %44 {offsets = [0, 0], sizes = [8, 224], strides = [1, 1]} : vector<24x224xf32> to vector<8x224xf32>
    %46 = vector.extract_strided_slice %44 {offsets = [8, 0], sizes = [8, 224], strides = [1, 1]} : vector<24x224xf32> to vector<8x224xf32>
    %47 = vector.extract_strided_slice %44 {offsets = [16, 0], sizes = [8, 224], strides = [1, 1]} : vector<24x224xf32> to vector<8x224xf32>
    %48 = arith.subf %45, %46 : vector<8x224xf32>
    %49 = arith.mulf %48, %47 : vector<8x224xf32>
    %50 = arith.addf %46, %49 : vector<8x224xf32>
    %c0_13 = arith.constant 0 : index
    %c0_14 = arith.constant 0 : index
    %c0_15 = arith.constant 0 : index
    %51 = vector.load %arg6[%c0_13, %c0_14, %c0_15] : memref<1x56x224xf32, #tpu.memory_space<vmem>>, vector<1x8x224xf32>
    %52 = vector.shape_cast %51 : vector<1x8x224xf32> to vector<8x224xf32>
    %53 = vector.shape_cast %50 : vector<8x224xf32> to vector<1x8x224xf32>
    tpu.vector_store %arg6[%c0_13, %c0_14, %c0_15], %53 {strides = array<i32>} : memref<1x56x224xf32, #tpu.memory_space<vmem>>, vector<1x8x224xf32>,
    %c0_16 = arith.constant 0 : index
    %c8 = arith.constant 8 : index
    %c0_17 = arith.constant 0 : index
    %54 = vector.load %arg6[%c0_16, %c8, %c0_17] : memref<1x56x224xf32, #tpu.memory_space<vmem>>, vector<1x24x224xf32>
    %55 = vector.shape_cast %54 : vector<1x24x224xf32> to vector<24x224xf32>
    %56 = vector.shape_cast %23 : vector<24x224xf32> to vector<1x24x224xf32>
    tpu.vector_store %arg6[%c0_16, %c8, %c0_17], %56 {strides = array<i32>} : memref<1x56x224xf32, #tpu.memory_space<vmem>>, vector<1x24x224xf32>,
    %c0_18 = arith.constant 0 : index
    %c32 = arith.constant 32 : index
    %c0_19 = arith.constant 0 : index
    %57 = vector.load %arg6[%c0_18, %c32, %c0_19] : memref<1x56x224xf32, #tpu.memory_space<vmem>>, vector<1x24x224xf32>
    %58 = vector.shape_cast %57 : vector<1x24x224xf32> to vector<24x224xf32>
    %59 = vector.shape_cast %44 : vector<24x224xf32> to vector<1x24x224xf32>
    tpu.vector_store %arg6[%c0_18, %c32, %c0_19], %59 {strides = array<i32>} : memref<1x56x224xf32, #tpu.memory_space<vmem>>, vector<1x24x224xf32>,
    return
  }
  func.func @transform_0(%arg0: i32) -> (i32, i32, i32) {
    %c0_i32 = arith.constant 0 : i32
    %c0_i32_0 = arith.constant 0 : i32
    %c0_i32_1 = arith.constant 0 : i32
    return %arg0, %c0_i32, %c0_i32_0 : i32, i32, i32
  }
  func.func @transform_1(%arg0: i32) -> (i32, i32, i32) {
    %c0_i32 = arith.constant 0 : i32
    %c0_i32_0 = arith.constant 0 : i32
    %c0_i32_1 = arith.constant 0 : i32
    return %arg0, %c0_i32, %c0_i32_0 : i32, i32, i32
  }
  func.func @transform_2(%arg0: i32) -> (i32, i32) {
    %c0_i32 = arith.constant 0 : i32
    %c0_i32_0 = arith.constant 0 : i32
    %c0_i32_1 = arith.constant 0 : i32
    return %c0_i32, %c0_i32_0 : i32, i32
  }
  func.func @transform_3(%arg0: i32) -> (i32, i32) {
    %c0_i32 = arith.constant 0 : i32
    %c0_i32_0 = arith.constant 0 : i32
    %c0_i32_1 = arith.constant 0 : i32
    return %c0_i32, %c0_i32_0 : i32, i32
  }
  func.func @transform_4(%arg0: i32) -> (i32, i32) {
    %c0_i32 = arith.constant 0 : i32
    %c0_i32_0 = arith.constant 0 : i32
    %c0_i32_1 = arith.constant 0 : i32
    return %c0_i32, %c0_i32_0 : i32, i32
  }
  func.func @transform_5(%arg0: i32) -> (i32, i32, i32) {
    %c0_i32 = arith.constant 0 : i32
    %c0_i32_0 = arith.constant 0 : i32
    %c0_i32_1 = arith.constant 0 : i32
    return %arg0, %c0_i32, %c0_i32_0 : i32, i32, i32
  }
}

</mosaic_0001>

<bundles_post_ra>
// kernel: convg2_forward.1
= control target key start
LH: loop header
LB: loop body
LE: loop exit
PB: predicated region body
PF: predicated region fallthrough
CT: control target
= control target key end

     0   :  { %s850_s18 = smov 0   ;;  %s969_s0 = inlined_call_operand.vmem [shape: f32[2,4,256], index: 0, kind: input, shape index: {}]   ;;  %s970_s1 = inlined_call_operand.vmem [shape: f32[2,4,256], index: 1, kind: input, shape index: {}]   ;;  %s971_s2 = inlined_call_operand.vmem [shape: bf16[24,72], index: 2, kind: input, shape index: {}]   ;;  %s972_s3 = inlined_call_operand.vmem [shape: f32[24,1], index: 3, kind: input, shape index: {}]   ;;  %s973_s4 = inlined_call_operand.vmem [shape: f32[24,5], index: 4, kind: input, shape index: {}]   ;;  %s974_s5 = inlined_call_operand.vmem [shape: f32[2,56,224], index: 5, kind: output, shape index: {}]  }
   0x1 LB: > { %s658_s19 = sadd.s32 4294967295, %s804_s18   ;;  %p662_p0 = scmp.ge.s32.totalorder %s804_s18, 1  ;;  %s804_s18 = sphi %s850_s18, %s15_s18  }
   0x2   : > { %p197_p1 = scmp.lt.s32.totalorder %s804_s18, 3 }
   0x4   : > { %p198_p2 = pnand %p662_p0, %p197_p1 }
   0x5   : > { %p230_p3 = scmp.lt.s32.totalorder (!%p198_p2), %s658_s19, 1  ;;  %s807_s27 = smov (!%p198_p2), 94  }
   0x6   : > { %201 = sbr.rel (%p198_p2) target bundleno = 415 (0x19f), region = 40  ;;  %s808_s28 = smov (!%p198_p2), 95  }
   0x7   : > { %s809_s29 = smov (!%p198_p2), 96   ;;  %s810_s30 = smov (!%p198_p2), 111  }
   0x8   : > { %s811_s6 = smov (!%p198_p2), 110   ;;  %s812_s7 = smov (!%p198_p2), 126  }
   0x9   : > { %s814_s8 = smov (!%p198_p2), 112   ;;  %s815_s9 = smov (!%p198_p2), 127  }
   0xb   : > { %s976_s19 = smov (!%p230_p3, %s658_s19), 1  ;;  %vm263_vm0 = vcmask 1043456   ;;  %v806_v7 = vmov 0.0   ;;  %v813_v9 = vmov 0   ;;  %v250_v10 = vld [vmem:[%s972_s3 + $0x8] sm:$0xff]  ;;  %v249_v11 = vld [vmem:[%s972_s3] sm:$0xff] }
   0xc   : > { %s681_s20 = sshll.u32 %s976_s19, 3  ;;  %417 = vmatprep.mubr.bf16.mxu0 %v813_v9  ;;  %427 = vmatprep.mubr.bf16.mxu1 %v813_v9  ;;  %v251_v12 = vld [vmem:[%s972_s3 + $0x10] sm:$0xff]  ;;  %v252_v13 = vld [vmem:[%s973_s4] sm:$0xff]  ;;  %v816_v14 = vmov 1   ;;  %v253_v15 = vld [vmem:[%s973_s4 + $0x8] sm:$0xff]  ;;  %v817_v16 = vmov 2  }
   0xd   : > { %s234_s23 = scalar_lea.vmem %s969_s0, %s681_s20  ;;  %s239_s26 = scalar_lea.vmem %s970_s1, %s681_s20  ;;  %757 = vset.pattern.permute.xlu1 %v813_v9  ;;  %756 = vset.pattern.permute.xlu0 %v813_v9  ;;  %v254_v17 = vld [vmem:[%s973_s4 + $0x10] sm:$0xff]  ;;  %v818_v18 = vmov 3   ;;  %v819_v19 = vmov 4   ;;  %vm323_vm1 = vcmask 777216   ;;  %vm334_vm2 = vcmask 769024  }
   0xe   : > { %v255_v0 = vld [vmem:[%s234_s23] sm:$0xff]  ;;  %vm312_vm3 = vcmask 785408   ;;  %vm296_vm4 = vcmask 908288   ;;  %vm304_vm5 = vcmask 900096   ;;  %vm280_vm6 = vcmask 1031168  }
   0xf   : > { %v256_v1 = vld [vmem:[%s239_s26] sm:$0xff]  ;;  %v258_v2 = vcombine.high %v255_v0, %v255_v0  ;;  %vm288_vm7 = vcmask 916480   ;;  %vm272_vm8 = vcmask 1039360   ;;  %vm372_vm9 = vcmask 588800  }
  0x10   : > { %v261_v3 = vcombine.low %v256_v1, %v256_v1 }
  0x11   : > { %v871_v5 = vsel %vm263_vm0, %v258_v2, %v256_v1 }
  0x12   : > { %v868_v4 = vsel %vm263_vm0, %v255_v0, %v261_v3  ;;  %v721_v8 = vpack.i.bf16 %v806_v7, %v871_v5  ;;  %v772_v3 = vld [vmem:[%s971_s2] sm:$0xff]  }
  0x13   : > { %v716_v6 = vpack.i.bf16 %v871_v5, %v868_v4 }
  0x14   : > { %722 = vrot.lane.b32.xlu1 %v721_v8, %s808_s28 }
  0x15   : > { %717 = vrot.lane.b32.xlu0 %v716_v6, %s807_s27 }
  0x18   : > { %727 = vrot.lane.b32.xlu1 %v716_v6, %s809_s29 }
  0x19   : > { %332 = vrot.lane.b32.xlu0 %v806_v7, %s807_s27 }
  0x1c   : > { %732 = vrot.lane.b32.xlu1 %v716_v6, %s810_s30 }
  0x1d   : > { %317 = vrot.lane.b32.xlu0 %v868_v4, %s808_s28  ;;  %s693_s28 = smul.u32 112, %s976_s19 }
  0x20   : > { %742 = vrot.lane.b32.xlu1 %v716_v6, %s812_s7 }
  0x21   : > { %737 = vrot.lane.b32.xlu0 %v716_v6, %s811_s6  ;;  %s913_s6 = scalar_lea.vmem %s974_s5, %s693_s28 }
  0x24   : > { %752 = vrot.lane.b32.xlu1 %v716_v6, %s815_s9 }
  0x25   : > { %747 = vrot.lane.b32.xlu0 %v716_v6, %s814_s8 }
  0x28   : > { %356 = vperm.xlu1 %757, %v250_v10  }
  0x29   : > { %351 = vperm.xlu0 %756, %v249_v11  }
  0x2c   : > { %361 = vperm.xlu1 %757, %v251_v12  }
  0x2d   : > { %758 = vset.pattern.permute.xlu0 %v816_v14 }
  0x2e   : > { %438 = vperm.xlu0 %758, %v252_v13  }
  0x30   : > { %759 = vset.pattern.permute.xlu1 %v816_v14 }
  0x31   : > { %443 = vperm.xlu1 %759, %v253_v15  }
  0x32   : > { %760 = vset.pattern.permute.xlu0 %v817_v16 }
  0x33   : > { %458 = vperm.xlu0 %760, %v252_v13  }
  0x35   : > { %448 = vperm.xlu1 %759, %v254_v17  }
  0x37   : > { %762 = vset.pattern.permute.xlu0 %v813_v9 }
  0x38   : > { %512 = vperm.xlu0 %762, %v252_v13  }
  0x39   : > { %761 = vset.pattern.permute.xlu1 %v817_v16 }
  0x3a   : > { %462 = vperm.xlu1 %761, %v253_v15  }
  0x3c   : > { %765 = vset.pattern.permute.xlu0 %v818_v18 }
  0x3d   : > { %534 = vperm.xlu0 %765, %v253_v15  }
  0x3e   : > { %466 = vperm.xlu1 %761, %v254_v17  }
  0x41   : > { %768 = vset.pattern.permute.xlu0 %v819_v19 }
  0x42   : > { %554 = vperm.xlu0 %768, %v252_v13   ;;  %763 = vset.pattern.permute.xlu1 %v813_v9 }
  0x43   : > { %516 = vperm.xlu1 %763, %v253_v15  }
  0x47   : > { %764 = vset.pattern.permute.xlu1 %v818_v18 }
  0x48   : > { %530 = vperm.xlu1 %764, %v252_v13  }
  0x4c   : > { %766 = vset.pattern.permute.xlu1 %v813_v9 }
  0x4d   : > { %520 = vperm.xlu1 %766, %v254_v17  }
  0x51   : > { %767 = vset.pattern.permute.xlu1 %v818_v18 }
  0x52   : > { %538 = vperm.xlu1 %767, %v254_v17  }
  0x56   : > { %769 = vset.pattern.permute.xlu1 %v819_v19 }
  0x57   : > { %558 = vperm.xlu1 %769, %v253_v15  }
  0x5b   : > { %562 = vperm.xlu1 %769, %v254_v17  }
  0x86   : > { %v723_v21 = vpop.permute.xlu1 %722 }
  0x87   : > { %v718_v20 = vpop.permute.xlu0 %717  ;;  %v725_v24 = vunpack.i.h.bf16 %v723_v21  ;;  %v724_v25 = vunpack.i.l.bf16 %v723_v21 }
  0x88   : > { %v720_v22 = vunpack.i.h.bf16 %v718_v20  ;;  %v719_v23 = vunpack.i.l.bf16 %v718_v20 }
  0x89   : > { %v325_v29 = vsel %vm323_vm1, %v724_v25, %v725_v24 }
  0x8a   : > { %v335_v26 = vsel %vm334_vm2, %v719_v23, %v720_v22  ;;  %v728_v28 = vpop.permute.xlu1 %727 }
  0x8b   : > { %v333_v27 = vpop.permute.xlu0 %332  ;;  %v347_v30 = vpack.c.bf16 %v335_v26, %v335_v26  ;;  %v730_v31 = vunpack.i.h.bf16 %v728_v28  ;;  %v729_v32 = vunpack.i.l.bf16 %v728_v28 }
  0x8c   : > { %v336_v33 = vsel %vm334_vm2, %v720_v22, %v333_v27 }
  0x8d   : > { %v348_v34 = vpack.c.bf16 %v336_v33, %v336_v33  ;;  %v346_v35 = vpack.c.bf16 %v325_v29, %v730_v31  ;;  %v313_v36 = vsel %vm312_vm3, %v729_v32, %v730_v31  ;;  %v380_v38 = vsel %vm263_vm0, %v347_v30, 0 }
  0x8e   : > { %v733_v39 = vpop.permute.xlu1 %732 }
  0x8f   : > { %v318_v37 = vpop.permute.xlu0 %317  ;;  %670 = vmatprep.subr.msk.bf16.mxu0 %vm263_vm0, %v348_v34  ;;  %683 = vmatprep.subr.msk.bf16.mxu1 %vm263_vm0, %v348_v34  ;;  %v735_v41 = vunpack.i.h.bf16 %v733_v39  ;;  %v734_v42 = vunpack.i.l.bf16 %v733_v39 }
  0x90   : > { %v324_v40 = vsel %vm323_vm1, %v318_v37, %v724_v25  ;;  %392 = vmatpush1.bf16.msra.mxu0 %v380_v38  ;;  %688 = vmatpush1.bf16.msra.mxu1 %v380_v38 }
  0x91   : > { %v345_v43 = vpack.c.bf16 %v324_v40, %v313_v36  ;;  %393 = vmatprep.subr.bf16.mxu0 %v346_v35  ;;  %684 = vmatprep.subr.bf16.mxu1 %v346_v35  ;;  %v297_v46 = vsel %vm296_vm4, %v734_v42, %v735_v41 }
  0x92   : > { %v743_v45 = vpop.permute.xlu1 %742 }
  0x93   : > { %v738_v44 = vpop.permute.xlu0 %737  ;;  %v745_v49 = vunpack.i.h.bf16 %v743_v45  ;;  %v744_v50 = vunpack.i.l.bf16 %v743_v45 }
  0x94   : > { %v740_v47 = vunpack.i.h.bf16 %v738_v44  ;;  %v739_v48 = vunpack.i.l.bf16 %v738_v44  ;;  %394 = vmatpush1.bf16.msra.mxu0 %v345_v43  ;;  %689 = vmatpush1.bf16.msra.mxu1 %v345_v43 }
  0x95   : > { %v281_v56 = vsel %vm280_vm6, %v744_v50, %v745_v49 }
  0x96   : > { %v344_v51 = vpack.c.bf16 %v740_v47, %v735_v41  ;;  %v305_v52 = vsel %vm304_vm5, %v739_v48, %v740_v47  ;;  %v753_v55 = vpop.permute.xlu1 %752 }
  0x97   : > { %v748_v53 = vpop.permute.xlu0 %747  ;;  %v343_v54 = vpack.c.bf16 %v305_v52, %v297_v46  ;;  %v755_v59 = vunpack.i.h.bf16 %v753_v55  ;;  %v754_v60 = vunpack.i.l.bf16 %v753_v55 }
  0x98   : > { %v750_v57 = vunpack.i.h.bf16 %v748_v53  ;;  %v749_v58 = vunpack.i.l.bf16 %v748_v53  ;;  %395 = vmatprep.subr.bf16.mxu0 %v344_v51  ;;  %685 = vmatprep.subr.bf16.mxu1 %v344_v51 }
  0x99   : > { %396 = vmatpush1.bf16.msra.mxu0 %v343_v54  ;;  %690 = vmatpush1.bf16.msra.mxu1 %v343_v54  ;;  %v340_v62 = vpack.c.bf16 %v755_v59, %v871_v5  ;;  %v273_v0 = vsel %vm272_vm8, %v754_v60, %v755_v59  ;;  %v773_v5 = vld [vmem:[%s971_s2 + $0x8] ss:$0 sps:$4 sm:$0xff]  }
  0x9a   : > { %v342_v61 = vpack.c.bf16 %v750_v57, %v745_v49  ;;  %v289_v63 = vsel %vm288_vm7, %v749_v58, %v750_v57  ;;  %v339_v2 = vpack.c.bf16 %v273_v0, %v868_v4 }
  0x9b   : > { %v341_v1 = vpack.c.bf16 %v289_v63, %v281_v56 }
  0x9c   : > { %397 = vmatprep.subr.bf16.mxu0 %v342_v61  ;;  %686 = vmatprep.subr.bf16.mxu1 %v342_v61 }
  0x9d   : > { %398 = vmatpush1.bf16.msra.mxu0 %v341_v1  ;;  %691 = vmatpush1.bf16.msra.mxu1 %v341_v1 }
  0x9e   : > { %399 = vmatprep.subr.bf16.mxu0 %v340_v62  ;;  %687 = vmatprep.subr.bf16.mxu1 %v340_v62 }
  0xa1   : > { %400 = vmatpush1.bf16.msra.mxu0 %v339_v2  ;;  %692 = vmatpush1.bf16.msra.mxu1 %v339_v2 }
  0xa3   : > { %v357_v6 = vpop.permute.xlu1 %356 }
  0xa4   : > { %671 = vmatmul.mubr.msk.bf16.vlgmr.msra.gmra.mxu0 %vm372_vm9, %v772_v3  ;;  %672 = vmatmul.mubr.msk.bf16.vlgmr.msra.gmra.mxu1 %vm372_vm9, %v773_v5  ;;  %v352_v4 = vpop.permute.xlu0 %351 }
  0xa7   : > { %v362_v7 = vpop.permute.xlu1 %361 }
  0xa9   : > { %v439_v11 = vpop.permute.xlu0 %438 }
  0xac   : > { %v444_v8 = vpop.permute.xlu1 %443 }
  0xae   : > { %v459_v19 = vpop.permute.xlu0 %458 }
  0xb0   : > { %v449_v9 = vpop.permute.xlu1 %448 }
  0xb3   : > { %v513_v60 = vpop.permute.xlu0 %512 }
  0xb5   : > { %v463_v10 = vpop.permute.xlu1 %462 }
  0xb8   : > { %v535_v0 = vpop.permute.xlu0 %534 }
  0xb9   : > { %v467_v18 = vpop.permute.xlu1 %466 }
  0xbe   : > { %v517_v45 = vpop.permute.xlu1 %516 }
  0xc3   : > { %v531_v47 = vpop.permute.xlu1 %530 }
  0xc8   : > { %v521_v54 = vpop.permute.xlu1 %520 }
  0xcd   : > { %v539_v62 = vpop.permute.xlu1 %538 }
  0xd2   : > { %v559_v63 = vpop.permute.xlu1 %558 }
 0x164   : > { %v419_v12 = vpop.f32.mrf.mxu0  ;;  %v429_v13 = vpop.f32.mrf.mxu1 }
 0x165   : > { %v915_v14 = vadd.f32 %v419_v12, %v352_v4  ;;  %v917_v15 = vadd.f32 %v429_v13, %v362_v7 }
 0x166   : > { %v421_v16 = vpop.f32.mrf.mxu0  ;;  %v431_v17 = vpop.f32.mrf.mxu1 }
 0x167   : > { %v451_v20 = vmul.f32 %v439_v11, %v915_v14  ;;  %579 = vst [vmem:[%s913_s6 + $0x10] sm:$0xff] %v915_v14  ;;  %v455_v21 = vmul.f32 %v449_v9, %v917_v15  ;;  %583 = vst [vmem:[%s913_s6 + $0x30] sm:$0xff] %v917_v15  ;;  %v925_v22 = vadd.f32 %v421_v16, %v352_v4 }
 0x168   : > { %v927_v23 = vadd.f32 %v431_v17, %v362_v7  ;;  %v423_v24 = vpop.f32.mrf.mxu0  ;;  %v433_v25 = vpop.f32.mrf.mxu1  ;;  %v541_v5 = vmul.f32 %v531_v47, %v915_v14  ;;  %v545_v7 = vmul.f32 %v539_v62, %v917_v15 }
 0x169   : > { %v469_v26 = vadd.f32 %v459_v19, %v451_v20  ;;  %v473_v27 = vadd.f32 %v467_v18, %v455_v21  ;;  %v452_v28 = vmul.f32 %v439_v11, %v925_v22  ;;  %580 = vst.msk [vmem:[%s913_s6 + $0x18] sm:$0xff] %vm312_vm3, %v925_v22  ;;  %v933_v29 = vadd.f32 %v423_v24, %v357_v6 }
 0x16a   : > { %v456_v30 = vmul.f32 %v449_v9, %v927_v23  ;;  %584 = vst.msk [vmem:[%s913_s6 + $0x38] sm:$0xff] %vm312_vm3, %v927_v23  ;;  %v425_v31 = vpop.f32.mrf.mxu0  ;;  %v434_v32 = vpop.f32.mrf.mxu1  ;;  %v542_v12 = vmul.f32 %v531_v47, %v925_v22 }
 0x16b   : > { %v673_v33 = vmul.f32 -1.442695, %v469_v26  ;;  %v677_v34 = vmul.f32 -1.442695, %v473_v27  ;;  %v470_v35 = vadd.f32 %v459_v19, %v452_v28  ;;  %v453_v36 = vmul.f32 %v444_v8, %v933_v29  ;;  %581 = vst [vmem:[%s913_s6 + $0x20] sm:$0xff] %v933_v29  ;;  %v555_v9 = vpop.permute.xlu0 %554 }
 0x16c   : > { %v474_v37 = vadd.f32 %v467_v18, %v456_v30  ;;  %v942_v38 = vadd.f32 %v425_v31, %v357_v6  ;;  %v546_v18 = vmul.f32 %v539_v62, %v927_v23  ;;  %v543_v14 = vmul.f32 %v535_v0, %v933_v29 }
 0x16d   : > { %774 = vpow2.f32 %v673_v33  ;;  %v674_v39 = vmul.f32 -1.442695, %v470_v35  ;;  %v471_v40 = vadd.f32 %v463_v10, %v453_v36 }
 0x16e   : > { %776 = vpow2.f32 %v677_v34  ;;  %v678_v41 = vmul.f32 -1.442695, %v474_v37  ;;  %v454_v42 = vmul.f32 %v444_v8, %v942_v38  ;;  %582 = vst.msk [vmem:[%s913_s6 + $0x28] sm:$0xff] %vm312_vm3, %v942_v38  ;;  %v544_v28 = vmul.f32 %v535_v0, %v942_v38 }
 0x16f   : > { %778 = vpow2.f32 %v674_v39  ;;  %v675_v43 = vmul.f32 -1.442695, %v471_v40 }
 0x170   : > { %780 = vpow2.f32 %v678_v41  ;;  %v472_v44 = vadd.f32 %v463_v10, %v454_v42  ;;  %v563_v10 = vpop.permute.xlu1 %562 }
 0x171   : > { %782 = vpow2.f32 %v675_v43 }
 0x172   : > { %v676_v46 = vmul.f32 -1.442695, %v472_v44 }
 0x174   : > { %784 = vpow2.f32 %v676_v46 }
 0x17a   : > { %v775_v48 = vpop.eup %774 }
 0x17b   : > { %v777_v49 = vpop.eup %776  ;;  %v493_v50 = vadd.f32 1.0, %v775_v48 }
 0x17c   : > { %v779_v51 = vpop.eup %778  ;;  %v497_v52 = vadd.f32 1.0, %v777_v49 }
 0x17d   : > { %v781_v53 = vpop.eup %780  ;;  %786 = vrcp.f32 %v493_v50  ;;  %v494_v55 = vadd.f32 1.0, %v779_v51 }
 0x17e   : > { %v783_v56 = vpop.eup %782  ;;  %788 = vrcp.f32 %v497_v52  ;;  %v498_v57 = vadd.f32 1.0, %v781_v53 }
 0x17f   : > { %790 = vrcp.f32 %v494_v55  ;;  %v495_v58 = vadd.f32 1.0, %v783_v56 }
 0x180   : > { %792 = vrcp.f32 %v498_v57 }
 0x181   : > { %v785_v59 = vpop.eup %784  ;;  %794 = vrcp.f32 %v495_v58 }
 0x182   : > { %v496_v61 = vadd.f32 1.0, %v785_v59 }
 0x184   : > { %796 = vrcp.f32 %v496_v61 }
 0x18a   : > { %v787_v1 = vpop.eup %786 }
 0x18b   : > { %v789_v2 = vpop.eup %788  ;;  %v523_v3 = vmul.f32 %v787_v1, %v513_v60 }
 0x18c   : > { %v791_v6 = vpop.eup %790  ;;  %v527_v8 = vmul.f32 %v789_v2, %v521_v54 }
 0x18d   : > { %v793_v4 = vpop.eup %792  ;;  %v524_v11 = vmul.f32 %v791_v6, %v513_v60  ;;  %v547_v13 = vadd.f32 %v541_v5, %v523_v3 }
 0x18e   : > { %v795_v16 = vpop.eup %794  ;;  %v528_v17 = vmul.f32 %v793_v4, %v521_v54  ;;  %v551_v19 = vadd.f32 %v545_v7, %v527_v8 }
 0x18f   : > { %v525_v20 = vmul.f32 %v795_v16, %v517_v45  ;;  %v548_v15 = vadd.f32 %v542_v12, %v524_v11  ;;  %v565_v21 = vadd.f32 %v555_v9, %v547_v13 }
 0x190   : > { %v552_v24 = vadd.f32 %v546_v18, %v528_v17  ;;  %v569_v25 = vadd.f32 %v563_v10, %v551_v19 }
 0x191   : > { %v797_v26 = vpop.eup %796  ;;  %v549_v22 = vadd.f32 %v543_v14, %v525_v20  ;;  %v566_v27 = vadd.f32 %v555_v9, %v548_v15  ;;  %585 = vst [vmem:[%s913_s6 + $0x40] sm:$0xff] %v565_v21 }
 0x192   : > { %v526_v23 = vmul.f32 %v797_v26, %v517_v45  ;;  %v570_v30 = vadd.f32 %v563_v10, %v552_v24  ;;  %589 = vst [vmem:[%s913_s6 + $0x60] sm:$0xff] %v569_v25 }
 0x193   : > { %v567_v29 = vadd.f32 %v559_v63, %v549_v22  ;;  %586 = vst.msk [vmem:[%s913_s6 + $0x48] sm:$0xff] %vm312_vm3, %v566_v27 }
 0x194   : > { %v550_v31 = vadd.f32 %v544_v28, %v526_v23  ;;  %590 = vst.msk [vmem:[%s913_s6 + $0x68] sm:$0xff] %vm312_vm3, %v570_v30 }
 0x195   : > { %587 = vst [vmem:[%s913_s6 + $0x50] sm:$0xff] %v567_v29  ;;  %v571_v32 = vsub.f32 %v565_v21, %v567_v29 }
 0x196   : > { %v568_v33 = vadd.f32 %v559_v63, %v550_v31 }
 0x197   : > { %v573_v34 = vmul.f32 %v571_v32, %v569_v25 }
 0x198   : > { %588 = vst.msk [vmem:[%s913_s6 + $0x58] sm:$0xff] %vm312_vm3, %v568_v33  ;;  %v572_v35 = vsub.f32 %v566_v27, %v568_v33 }
 0x199   : > { %v575_v36 = vadd.f32 %v573_v34, %v567_v29 }
 0x19a   : > { %v574_v37 = vmul.f32 %v572_v35, %v570_v30 }
 0x19b   : > { %577 = vst [vmem:[%s913_s6] sm:$0xff] %v575_v36 }
 0x19c   : > { %v576_v38 = vadd.f32 %v574_v37, %v568_v33 }
 0x19e   : > { %578 = vst.msk [vmem:[%s913_s6 + $0x8] sm:$0xff] %vm312_vm3, %v576_v38 }
 0x19f PF: > { %s15_s18 = sadd.s32 1, %s804_s18  }
 0x1a0   : > { %p12_p4 = scmp.ge.s32.totalorder %s15_s18, 4  }
 0x1a2   :  { %14 = sbr.rel (!%p12_p4) target bundleno = 1 (0x1), region = 73 }

</bundles_post_ra>
